<compile_context>
chip_gen: v6e
topology: v6e:2x2x1
jax: 0.10.0
libtpu: 0.0.40
codegen_flags: <defaults>
</compile_context>

<pallas_src>
import jax
import jax.numpy as jnp
from jax.experimental import pallas as pl
from jax.experimental.pallas import tpu as pltpu


def _cdiv(a, b):
    return (a + b - 1) // b


def _round_up(x, m):
    return _cdiv(x, m) * m


def _tpu_cores_and_gen():
    """Best-effort (tensorcores_per_chip, is_v7x); never raises."""
    cores, is_v7 = 1, False
    kind = ""
    try:
        kind = jax.devices()[0].device_kind.lower()
    except Exception:
        pass
    if "v7" in kind:
        is_v7, cores = True, 2
    try:
        info = pltpu.get_tpu_info()
        for attr in ("num_cores", "cores_per_chip", "num_tensorcores",
                     "tensorcores_per_chip"):
            v = getattr(info, attr, None)
            if isinstance(v, int) and v > 0:
                cores = v
                break
    except Exception:
        pass
    return cores, is_v7


def _partial_sums_kernel(pred_ref, true_ref, out_ref):
    """Accumulate per-core partial sums of [CE, intersection, sum(targets)].

    pred_ref / true_ref : (Bb, C, TS, 128) blocks of logits / soft targets.
    out_ref             : (3, 8, 128) f32, resident per-core accumulator.
    """
    b = pl.program_id(1)
    p = pl.program_id(2)

    @pl.when((b == 0) & (p == 0))
    def _init():
        out_ref[...] = jnp.zeros_like(out_ref)

    preds = pred_ref[...]            # (Bb, C, TS, 128), native dtype
    trues = true_ref[...]
    nclass = preds.shape[1]

    # Numerically stable softmax pieces over the class axis, unrolled as
    # elementwise ops across the C (TS, 128) vreg-slabs -> pure VPU work,
    # no sublane reductions, no sublane padding.
    m = preds[:, 0].astype(jnp.float32)                       # (Bb, TS, 128)
    for c in range(1, nclass):
        m = jnp.maximum(m, preds[:, c].astype(jnp.float32))

    sum_e = jnp.zeros_like(m)
    t_sum = jnp.zeros_like(m)
    t_z = jnp.zeros_like(m)
    t_e = jnp.zeros_like(m)
    for c in range(nclass):
        zc = preds[:, c].astype(jnp.float32) - m
        ec = jnp.exp(zc)                                      # single exp pass (EUP)
        tc = trues[:, c].astype(jnp.float32)
        sum_e = sum_e + ec
        t_sum = t_sum + tc
        t_z = t_z + tc * zc
        t_e = t_e + tc * ec

    lse = jnp.log(sum_e)
    ce_pix = t_sum * lse - t_z                                # -sum_c t * log_softmax
    inter_pix = t_e / sum_e                                   # sum_c t * softmax

    bb, ts, lanes = m.shape
    nv = (bb * ts) // 8                                       # TS is a multiple of 8

    def fold(x):                                              # (Bb,TS,128) -> (8,128)
        return jnp.sum(x.reshape(nv, 8, lanes), axis=0)       # elementwise vreg adds

    out_ref[0] = out_ref[0] + fold(ce_pix)
    out_ref[1] = out_ref[1] + fold(inter_pix)
    out_ref[2] = out_ref[2] + fold(t_sum)


def combine_loss_pallas(y_pred, y_true, alpha=0.7, eps=1e-6,
                        tile_cols=None, num_cores=None,
                        cast_targets_bf16=True):
    """alpha * CE(y_pred, y_true) + (1 - alpha) * Dice(y_pred, y_true)."""
    B, C, H, W = y_pred.shape
    HW = H * W
    n_pix = float(B * HW)

    # Targets are (soft) one-hot; bf16 is exact for 0/1 and halves the largest
    # remaining HBM stream. Disable via cast_targets_bf16=False for soft targets
    # that need full f32 precision.
    if cast_targets_bf16 and y_true.dtype == jnp.float32:
        y_true = y_true.astype(jnp.bfloat16)

    detected_cores, is_v7x = _tpu_cores_and_gen()
    nc_req = detected_cores if num_cores is None else int(num_cores)

    S_total = _cdiv(HW, 128)                 # number of 128-pixel lane columns
    # Split pixel columns across TensorCores only when each core gets at least
    # one full (8, 128) vreg row of work (only >1 on v7x in practice).
    nc = nc_req if (nc_req > 1 and S_total >= 8 * nc_req) else 1
    S_core = _cdiv(S_total, nc)

    # Per-input, per-buffer block byte cap: ~2 MiB keeps DMA steps near ~85% of
    # HBM roofline on v5e/v6e; v7x (3.2 TB/s) gets ~4 MiB so the ~0.35 us fixed
    # per-step cost stays under ~10%.
    cap_bytes = (4 << 20) if is_v7x else (2 << 20)
    itemsize = max(y_pred.dtype.itemsize, y_true.dtype.itemsize)
    cap_cols = max(8, (cap_bytes // (C * 128 * itemsize)) // 8 * 8)

    if tile_cols is not None:
        ts = max(8, (int(tile_cols) // 8) * 8)
        ppc = _cdiv(S_core, ts)
        Bb = 1
    elif S_core <= cap_cols:
        # One tile covers a whole image per core: pack batch rows per block so
        # small images still get near-roofline DMA steps.
        ts = _round_up(S_core, 8)
        ppc = 1
        Bb = int(max(1, min(B, cap_cols // ts)))
    else:
        # Size the tile to the work so padding stays below 8 columns per core.
        ppc = _cdiv(S_core, cap_cols)
        ts = _round_up(_cdiv(S_core, ppc), 8)
        Bb = 1

    S_pad = nc * ppc * ts
    nb = _cdiv(B, Bb)
    B_pad = nb * Bb

    # Lane-dense layout (B, C, S_pad, 128): contiguous reshape + zero pad.
    yp = y_pred.reshape(B, C, HW)
    yt = y_true.reshape(B, C, HW)
    pad_pix = S_pad * 128 - HW
    if pad_pix or B_pad != B:
        # Padded pixels / batch rows carry zero targets -> contribute nothing
        # to CE, intersection or sum(targets).
        yp = jnp.pad(yp, ((0, B_pad - B), (0, 0), (0, pad_pix)))
        yt = jnp.pad(yt, ((0, B_pad - B), (0, 0), (0, pad_pix)))
    yp = yp.reshape(B_pad, C, S_pad, 128)
    yt = yt.reshape(B_pad, C, S_pad, 128)

    # VMEM budget from the actual block footprint: double-buffered inputs plus
    # f32 in-kernel temporaries, never clamped below the estimate.
    blk_in = Bb * C * ts * 128 * (yp.dtype.itemsize + yt.dtype.itemsize)
    blk_f32 = Bb * C * ts * 128 * 4
    vmem_limit = int(max(16 << 20, 2 * blk_in + 4 * blk_f32 + (2 << 20)))

    def in_map(c, b, p):
        return (b, 0, c * ppc + p, 0)

    if nc > 1 and is_v7x and nc <= detected_cores:
        # Only CORE_PARALLEL actually shards a grid axis across v7x's 2 TCs.
        dims = (pltpu.CORE_PARALLEL, pltpu.ARBITRARY, pltpu.ARBITRARY)
    else:
        dims = ("arbitrary", "arbitrary", "arbitrary")

    partials = pl.pallas_call(
        _partial_sums_kernel,
        out_shape=jax.ShapeDtypeStruct((nc, 3, 8, 128), jnp.float32),
        grid_spec=pltpu.PrefetchScalarGridSpec(
            num_scalar_prefetch=0,
            grid=(nc, nb, ppc),
            in_specs=[
                pl.BlockSpec((Bb, C, ts, 128), in_map),
                pl.BlockSpec((Bb, C, ts, 128), in_map),
            ],
            out_specs=pl.BlockSpec((None, 3, 8, 128),
                                   lambda c, b, p: (c, 0, 0, 0)),
        ),
        compiler_params=pltpu.CompilerParams(
            dimension_semantics=dims,
            vmem_limit_bytes=vmem_limit,
        ),
    )(yp, yt)

    # Tiny final cross-lane reduction + alpha-weighted combine in the wrapper.
    ce_sum = jnp.sum(partials[:, 0])
    inter = jnp.sum(partials[:, 1])
    t_sum = jnp.sum(partials[:, 2])

    ce_mean = ce_sum / n_pix                                       # l1
    # sum(softmax probs) over classes == 1 per (real) pixel -> exactly n_pix.
    dice_loss = 1.0 - (2.0 * inter + eps) / (n_pix + t_sum + eps)  # l2
    return (alpha * ce_mean + (1.0 - alpha) * dice_loss).astype(jnp.float32)


def combine_loss_ref(y_pred, y_true, alpha=0.7, eps=1e-6):
    """Pure-JAX reference of the same combined loss (f32 math)."""
    y_pred = y_pred.astype(jnp.float32)
    y_true = y_true.astype(jnp.float32)
    logp = jax.nn.log_softmax(y_pred, axis=1)
    p = jax.nn.softmax(y_pred, axis=1)
    ce = -jnp.sum(y_true * logp, axis=1).mean()
    inter = jnp.sum(p * y_true)
    denom = jnp.sum(p) + jnp.sum(y_true)
    dice_loss = 1.0 - (2.0 * inter + eps) / (denom + eps)
    return alpha * ce + (1.0 - alpha) * dice_loss


if __name__ == "__main__":
    key = jax.random.PRNGKey(0)
    alpha = 0.7

    # 1) base shape, f32, single-tile batch-packed path
    B, C, H, W = 2, 4, 16, 16
    k_pred, k_lbl = jax.random.split(key)
    y_pred = jax.random.normal(k_pred, (B, C, H, W), dtype=jnp.float32)
    labels = jax.random.randint(k_lbl, (B, H, W), 0, C)
    y_true = jax.nn.one_hot(labels, C, axis=1, dtype=jnp.float32)  # (B,C,H,W)

    loss = combine_loss_pallas(y_pred, y_true, alpha=alpha)
    jax.block_until_ready(loss)
    ref = combine_loss_ref(y_pred, y_true, alpha=alpha)
    assert jnp.allclose(loss, ref, atol=1e-4, rtol=1e-4), (loss, ref)

    # 2) bf16 logits (half the logit HBM bytes), upcast in-kernel
    y_pred_bf = y_pred.astype(jnp.bfloat16)
    loss2 = combine_loss_pallas(y_pred_bf, y_true, alpha=alpha)
    jax.block_until_ready(loss2)
    ref2 = combine_loss_ref(y_pred_bf, y_true, alpha=alpha)
    assert jnp.allclose(loss2, ref2, atol=1e-4, rtol=1e-4), (loss2, ref2)

    # 3) non-128-multiple spatial size -> exercises column/lane padding
    B3, C3, H3, W3 = 2, 3, 12, 12
    k3p, k3l = jax.random.split(jax.random.PRNGKey(1))
    y_pred3 = jax.random.normal(k3p, (B3, C3, H3, W3), dtype=jnp.float32)
    labels3 = jax.random.randint(k3l, (B3, H3, W3), 0, C3)
    y_true3 = jax.nn.one_hot(labels3, C3, axis=1, dtype=jnp.float32)
    loss3 = combine_loss_pallas(y_pred3, y_true3, alpha=alpha)
    jax.block_until_ready(loss3)
    ref3 = combine_loss_ref(y_pred3, y_true3, alpha=alpha)
    assert jnp.allclose(loss3, ref3, atol=1e-4, rtol=1e-4), (loss3, ref3)

    # 4) larger spatial + forced small tile + forced 2-way column split:
    #    exercises the multi-tile grid and the core-split indexing
    #    (serial "arbitrary" axis on single-TensorCore chips)
    B4, C4, H4, W4 = 2, 3, 64, 64
    k4p, k4l = jax.random.split(jax.random.PRNGKey(2))
    y_pred4 = jax.random.normal(k4p, (B4, C4, H4, W4), dtype=jnp.float32)
    labels4 = jax.random.randint(k4l, (B4, H4, W4), 0, C4)
    y_true4 = jax.nn.one_hot(labels4, C4, axis=1, dtype=jnp.float32)
    loss4 = combine_loss_pallas(y_pred4, y_true4, alpha=alpha,
                                tile_cols=8, num_cores=2)
    jax.block_until_ready(loss4)
    ref4 = combine_loss_ref(y_pred4, y_true4, alpha=alpha)
    assert jnp.allclose(loss4, ref4, atol=1e-4, rtol=1e-4), (loss4, ref4)

    # 5) f32-target path (bf16 cast disabled) + batch packing with B=4
    B5, C5, H5, W5 = 4, 4, 16, 16
    k5p, k5l = jax.random.split(jax.random.PRNGKey(3))
    y_pred5 = jax.random.normal(k5p, (B5, C5, H5, W5), dtype=jnp.float32)
    labels5 = jax.random.randint(k5l, (B5, H5, W5), 0, C5)
    y_true5 = jax.nn.one_hot(labels5, C5, axis=1, dtype=jnp.float32)
    loss5 = combine_loss_pallas(y_pred5, y_true5, alpha=alpha,
                                cast_targets_bf16=False)
    jax.block_until_ready(loss5)
    ref5 = combine_loss_ref(y_pred5, y_true5, alpha=alpha)
    assert jnp.allclose(loss5, ref5, atol=1e-4, rtol=1e-4), (loss5, ref5)

    print("KERNEL_OK")
</pallas_src>

<mosaic_0001>
module attributes {stable_mosaic.version = 11 : i64} {
  func.func @_partial_sums_kernel(%arg0: i32, %arg1: i32, %arg2: i32, %arg3: memref<2x4x8x128xf32, #tpu.memory_space<vmem>>, %arg4: memref<2x4x8x128xbf16, #tpu.memory_space<vmem>>, %arg5: memref<1x3x8x128xf32, #tpu.memory_space<vmem>>) attributes {dimension_semantics = [#tpu.dimension_semantics<arbitrary>, #tpu.dimension_semantics<arbitrary>, #tpu.dimension_semantics<arbitrary>], iteration_bounds = array<i64: 1, 1, 1>, scalar_prefetch = 0 : i64, scratch_operands = 0 : i64, tpu.core_type = #tpu.core_type<tc>, window_params = [{transform_indices = @transform_0, window_bounds = array<i64: 2, 4, 8, 128>}, {transform_indices = @transform_1, window_bounds = array<i64: 2, 4, 8, 128>}, {transform_indices = @transform_2, window_bounds = array<i64: 1, 3, 8, 128>}]} {
    %c0_i32 = arith.constant 0 : i32
    %0 = arith.cmpi eq, %arg1, %c0_i32 : i32
    %c0_i32_0 = arith.constant 0 : i32
    %1 = arith.cmpi eq, %arg2, %c0_i32_0 : i32
    %2 = arith.andi %0, %1 : i1
    %3 = arith.extui %2 : i1 to i32
    %c0_i32_1 = arith.constant 0 : i32
    %4 = arith.cmpi ne, %3, %c0_i32_1 : i32
    scf.if %4 {
      %cst_37 = arith.constant 0.000000e+00 : f32
      %99 = vector.broadcast %cst_37 : f32 to vector<3x8x128xf32>
      %c0_38 = arith.constant 0 : index
      %c0_39 = arith.constant 0 : index
      %c0_40 = arith.constant 0 : index
      %c0_41 = arith.constant 0 : index
      %100 = vector.load %arg5[%c0_38, %c0_39, %c0_40, %c0_41] : memref<1x3x8x128xf32, #tpu.memory_space<vmem>>, vector<1x3x8x128xf32>
      %101 = vector.shape_cast %100 : vector<1x3x8x128xf32> to vector<3x8x128xf32>
      %102 = vector.shape_cast %99 : vector<3x8x128xf32> to vector<1x3x8x128xf32>
      tpu.vector_store %arg5[%c0_38, %c0_39, %c0_40, %c0_41], %102 {strides = array<i32>} : memref<1x3x8x128xf32, #tpu.memory_space<vmem>>, vector<1x3x8x128xf32>,
    } else {
    }
    %c0 = arith.constant 0 : index
    %c0_2 = arith.constant 0 : index
    %c0_3 = arith.constant 0 : index
    %c0_4 = arith.constant 0 : index
    %5 = vector.load %arg3[%c0, %c0_2, %c0_3, %c0_4] : memref<2x4x8x128xf32, #tpu.memory_space<vmem>>, vector<2x4x8x128xf32>
    %c0_5 = arith.constant 0 : index
    %c0_6 = arith.constant 0 : index
    %c0_7 = arith.constant 0 : index
    %c0_8 = arith.constant 0 : index
    %6 = vector.load %arg4[%c0_5, %c0_6, %c0_7, %c0_8] : memref<2x4x8x128xbf16, #tpu.memory_space<vmem>>, vector<2x4x8x128xbf16>
    %7 = vector.extract_strided_slice %5 {offsets = [0, 0, 0, 0], sizes = [2, 1, 8, 128], strides = [1, 1, 1, 1]} : vector<2x4x8x128xf32> to vector<2x1x8x128xf32>
    %8 = vector.shape_cast %7 : vector<2x1x8x128xf32> to vector<2x8x128xf32>
    %9 = vector.extract_strided_slice %5 {offsets = [0, 1, 0, 0], sizes = [2, 1, 8, 128], strides = [1, 1, 1, 1]} : vector<2x4x8x128xf32> to vector<2x1x8x128xf32>
    %10 = vector.shape_cast %9 : vector<2x1x8x128xf32> to vector<2x8x128xf32>
    %11 = arith.maximumf %8, %10 : vector<2x8x128xf32>
    %12 = vector.extract_strided_slice %5 {offsets = [0, 2, 0, 0], sizes = [2, 1, 8, 128], strides = [1, 1, 1, 1]} : vector<2x4x8x128xf32> to vector<2x1x8x128xf32>
    %13 = vector.shape_cast %12 : vector<2x1x8x128xf32> to vector<2x8x128xf32>
    %14 = arith.maximumf %11, %13 : vector<2x8x128xf32>
    %15 = vector.extract_strided_slice %5 {offsets = [0, 3, 0, 0], sizes = [2, 1, 8, 128], strides = [1, 1, 1, 1]} : vector<2x4x8x128xf32> to vector<2x1x8x128xf32>
    %16 = vector.shape_cast %15 : vector<2x1x8x128xf32> to vector<2x8x128xf32>
    %17 = arith.maximumf %14, %16 : vector<2x8x128xf32>
    %cst = arith.constant 0.000000e+00 : f32
    %18 = vector.broadcast %cst : f32 to vector<2x8x128xf32>
    %cst_9 = arith.constant 0.000000e+00 : f32
    %19 = vector.broadcast %cst_9 : f32 to vector<2x8x128xf32>
    %cst_10 = arith.constant 0.000000e+00 : f32
    %20 = vector.broadcast %cst_10 : f32 to vector<2x8x128xf32>
    %cst_11 = arith.constant 0.000000e+00 : f32
    %21 = vector.broadcast %cst_11 : f32 to vector<2x8x128xf32>
    %22 = vector.extract_strided_slice %5 {offsets = [0, 0, 0, 0], sizes = [2, 1, 8, 128], strides = [1, 1, 1, 1]} : vector<2x4x8x128xf32> to vector<2x1x8x128xf32>
    %23 = vector.shape_cast %22 : vector<2x1x8x128xf32> to vector<2x8x128xf32>
    %24 = arith.subf %23, %17 : vector<2x8x128xf32>
    %25 = math.exp %24 : vector<2x8x128xf32>
    %26 = vector.extract_strided_slice %6 {offsets = [0, 0, 0, 0], sizes = [2, 1, 8, 128], strides = [1, 1, 1, 1]} : vector<2x4x8x128xbf16> to vector<2x1x8x128xbf16>
    %27 = vector.shape_cast %26 : vector<2x1x8x128xbf16> to vector<2x8x128xbf16>
    %28 = arith.extf %27 : vector<2x8x128xbf16> to vector<2x8x128xf32>
    %29 = arith.addf %18, %25 : vector<2x8x128xf32>
    %30 = arith.addf %19, %28 : vector<2x8x128xf32>
    %31 = arith.mulf %28, %24 : vector<2x8x128xf32>
    %32 = arith.addf %20, %31 : vector<2x8x128xf32>
    %33 = arith.mulf %28, %25 : vector<2x8x128xf32>
    %34 = arith.addf %21, %33 : vector<2x8x128xf32>
    %35 = vector.extract_strided_slice %5 {offsets = [0, 1, 0, 0], sizes = [2, 1, 8, 128], strides = [1, 1, 1, 1]} : vector<2x4x8x128xf32> to vector<2x1x8x128xf32>
    %36 = vector.shape_cast %35 : vector<2x1x8x128xf32> to vector<2x8x128xf32>
    %37 = arith.subf %36, %17 : vector<2x8x128xf32>
    %38 = math.exp %37 : vector<2x8x128xf32>
    %39 = vector.extract_strided_slice %6 {offsets = [0, 1, 0, 0], sizes = [2, 1, 8, 128], strides = [1, 1, 1, 1]} : vector<2x4x8x128xbf16> to vector<2x1x8x128xbf16>
    %40 = vector.shape_cast %39 : vector<2x1x8x128xbf16> to vector<2x8x128xbf16>
    %41 = arith.extf %40 : vector<2x8x128xbf16> to vector<2x8x128xf32>
    %42 = arith.addf %29, %38 : vector<2x8x128xf32>
    %43 = arith.addf %30, %41 : vector<2x8x128xf32>
    %44 = arith.mulf %41, %37 : vector<2x8x128xf32>
    %45 = arith.addf %32, %44 : vector<2x8x128xf32>
    %46 = arith.mulf %41, %38 : vector<2x8x128xf32>
    %47 = arith.addf %34, %46 : vector<2x8x128xf32>
    %48 = vector.extract_strided_slice %5 {offsets = [0, 2, 0, 0], sizes = [2, 1, 8, 128], strides = [1, 1, 1, 1]} : vector<2x4x8x128xf32> to vector<2x1x8x128xf32>
    %49 = vector.shape_cast %48 : vector<2x1x8x128xf32> to vector<2x8x128xf32>
    %50 = arith.subf %49, %17 : vector<2x8x128xf32>
    %51 = math.exp %50 : vector<2x8x128xf32>
    %52 = vector.extract_strided_slice %6 {offsets = [0, 2, 0, 0], sizes = [2, 1, 8, 128], strides = [1, 1, 1, 1]} : vector<2x4x8x128xbf16> to vector<2x1x8x128xbf16>
    %53 = vector.shape_cast %52 : vector<2x1x8x128xbf16> to vector<2x8x128xbf16>
    %54 = arith.extf %53 : vector<2x8x128xbf16> to vector<2x8x128xf32>
    %55 = arith.addf %42, %51 : vector<2x8x128xf32>
    %56 = arith.addf %43, %54 : vector<2x8x128xf32>
    %57 = arith.mulf %54, %50 : vector<2x8x128xf32>
    %58 = arith.addf %45, %57 : vector<2x8x128xf32>
    %59 = arith.mulf %54, %51 : vector<2x8x128xf32>
    %60 = arith.addf %47, %59 : vector<2x8x128xf32>
    %61 = vector.extract_strided_slice %5 {offsets = [0, 3, 0, 0], sizes = [2, 1, 8, 128], strides = [1, 1, 1, 1]} : vector<2x4x8x128xf32> to vector<2x1x8x128xf32>
    %62 = vector.shape_cast %61 : vector<2x1x8x128xf32> to vector<2x8x128xf32>
    %63 = arith.subf %62, %17 : vector<2x8x128xf32>
    %64 = math.exp %63 : vector<2x8x128xf32>
    %65 = vector.extract_strided_slice %6 {offsets = [0, 3, 0, 0], sizes = [2, 1, 8, 128], strides = [1, 1, 1, 1]} : vector<2x4x8x128xbf16> to vector<2x1x8x128xbf16>
    %66 = vector.shape_cast %65 : vector<2x1x8x128xbf16> to vector<2x8x128xbf16>
    %67 = arith.extf %66 : vector<2x8x128xbf16> to vector<2x8x128xf32>
    %68 = arith.addf %55, %64 : vector<2x8x128xf32>
    %69 = arith.addf %56, %67 : vector<2x8x128xf32>
    %70 = arith.mulf %67, %63 : vector<2x8x128xf32>
    %71 = arith.addf %58, %70 : vector<2x8x128xf32>
    %72 = arith.mulf %67, %64 : vector<2x8x128xf32>
    %73 = arith.addf %60, %72 : vector<2x8x128xf32>
    %74 = math.log %68 : vector<2x8x128xf32>
    %75 = arith.mulf %69, %74 : vector<2x8x128xf32>
    %76 = arith.subf %75, %71 : vector<2x8x128xf32>
    %77 = arith.divf %73, %68 : vector<2x8x128xf32>
    %c0_12 = arith.constant 0 : index
    %c0_13 = arith.constant 0 : index
    %c0_14 = arith.constant 0 : index
    %c0_15 = arith.constant 0 : index
    %78 = vector.load %arg5[%c0_12, %c0_13, %c0_14, %c0_15] : memref<1x3x8x128xf32, #tpu.memory_space<vmem>>, vector<1x1x8x128xf32>
    %79 = vector.shape_cast %78 : vector<1x1x8x128xf32> to vector<8x128xf32>
    %cst_16 = arith.constant dense<0.000000e+00> : vector<8x128xf32>
    %80 = vector.multi_reduction <add>, %76, %cst_16 [0] : vector<2x8x128xf32> to vector<8x128xf32>
    %81 = arith.addf %79, %80 : vector<8x128xf32>
    %c0_17 = arith.constant 0 : index
    %c0_18 = arith.constant 0 : index
    %c0_19 = arith.constant 0 : index
    %c0_20 = arith.constant 0 : index
    %82 = vector.load %arg5[%c0_17, %c0_18, %c0_19, %c0_20] : memref<1x3x8x128xf32, #tpu.memory_space<vmem>>, vector<1x1x8x128xf32>
    %83 = vector.shape_cast %82 : vector<1x1x8x128xf32> to vector<8x128xf32>
    %84 = vector.shape_cast %81 : vector<8x128xf32> to vector<1x1x8x128xf32>
    tpu.vector_store %arg5[%c0_17, %c0_18, %c0_19, %c0_20], %84 {strides = array<i32>} : memref<1x3x8x128xf32, #tpu.memory_space<vmem>>, vector<1x1x8x128xf32>,
    %c0_21 = arith.constant 0 : index
    %c1 = arith.constant 1 : index
    %c0_22 = arith.constant 0 : index
    %c0_23 = arith.constant 0 : index
    %85 = vector.load %arg5[%c0_21, %c1, %c0_22, %c0_23] : memref<1x3x8x128xf32, #tpu.memory_space<vmem>>, vector<1x1x8x128xf32>
    %86 = vector.shape_cast %85 : vector<1x1x8x128xf32> to vector<8x128xf32>
    %cst_24 = arith.constant dense<0.000000e+00> : vector<8x128xf32>
    %87 = vector.multi_reduction <add>, %77, %cst_24 [0] : vector<2x8x128xf32> to vector<8x128xf32>
    %88 = arith.addf %86, %87 : vector<8x128xf32>
    %c0_25 = arith.constant 0 : index
    %c1_26 = arith.constant 1 : index
    %c0_27 = arith.constant 0 : index
    %c0_28 = arith.constant 0 : index
    %89 = vector.load %arg5[%c0_25, %c1_26, %c0_27, %c0_28] : memref<1x3x8x128xf32, #tpu.memory_space<vmem>>, vector<1x1x8x128xf32>
    %90 = vector.shape_cast %89 : vector<1x1x8x128xf32> to vector<8x128xf32>
    %91 = vector.shape_cast %88 : vector<8x128xf32> to vector<1x1x8x128xf32>
    tpu.vector_store %arg5[%c0_25, %c1_26, %c0_27, %c0_28], %91 {strides = array<i32>} : memref<1x3x8x128xf32, #tpu.memory_space<vmem>>, vector<1x1x8x128xf32>,
    %c0_29 = arith.constant 0 : index
    %c2 = arith.constant 2 : index
    %c0_30 = arith.constant 0 : index
    %c0_31 = arith.constant 0 : index
    %92 = vector.load %arg5[%c0_29, %c2, %c0_30, %c0_31] : memref<1x3x8x128xf32, #tpu.memory_space<vmem>>, vector<1x1x8x128xf32>
    %93 = vector.shape_cast %92 : vector<1x1x8x128xf32> to vector<8x128xf32>
    %cst_32 = arith.constant dense<0.000000e+00> : vector<8x128xf32>
    %94 = vector.multi_reduction <add>, %69, %cst_32 [0] : vector<2x8x128xf32> to vector<8x128xf32>
    %95 = arith.addf %93, %94 : vector<8x128xf32>
    %c0_33 = arith.constant 0 : index
    %c2_34 = arith.constant 2 : index
    %c0_35 = arith.constant 0 : index
    %c0_36 = arith.constant 0 : index
    %96 = vector.load %arg5[%c0_33, %c2_34, %c0_35, %c0_36] : memref<1x3x8x128xf32, #tpu.memory_space<vmem>>, vector<1x1x8x128xf32>
    %97 = vector.shape_cast %96 : vector<1x1x8x128xf32> to vector<8x128xf32>
    %98 = vector.shape_cast %95 : vector<8x128xf32> to vector<1x1x8x128xf32>
    tpu.vector_store %arg5[%c0_33, %c2_34, %c0_35, %c0_36], %98 {strides = array<i32>} : memref<1x3x8x128xf32, #tpu.memory_space<vmem>>, vector<1x1x8x128xf32>,
    return
  }
  func.func @transform_0(%arg0: i32, %arg1: i32, %arg2: i32) -> (i32, i32, i32, i32) {
    %c1_i32 = arith.constant 1 : i32
    %0 = arith.muli %arg0, %c1_i32 : i32
    %1 = arith.addi %0, %arg2 : i32
    %c0_i32 = arith.constant 0 : i32
    %c0_i32_0 = arith.constant 0 : i32
    %c0_i32_1 = arith.constant 0 : i32
    return %arg1, %c0_i32, %1, %c0_i32_0 : i32, i32, i32, i32
  }
  func.func @transform_1(%arg0: i32, %arg1: i32, %arg2: i32) -> (i32, i32, i32, i32) {
    %c1_i32 = arith.constant 1 : i32
    %0 = arith.muli %arg0, %c1_i32 : i32
    %1 = arith.addi %0, %arg2 : i32
    %c0_i32 = arith.constant 0 : i32
    %c0_i32_0 = arith.constant 0 : i32
    %c0_i32_1 = arith.constant 0 : i32
    return %arg1, %c0_i32, %1, %c0_i32_0 : i32, i32, i32, i32
  }
  func.func @transform_2(%arg0: i32, %arg1: i32, %arg2: i32) -> (i32, i32, i32, i32) {
    %c0_i32 = arith.constant 0 : i32
    %c0_i32_0 = arith.constant 0 : i32
    %c0_i32_1 = arith.constant 0 : i32
    %c0_i32_2 = arith.constant 0 : i32
    return %arg0, %c0_i32, %c0_i32_0, %c0_i32_1 : i32, i32, i32, i32
  }
}

</mosaic_0001>

<bundles_post_ra>
// kernel: tpu_custom_call.1
= control target key start
LH: loop header
LB: loop body
LE: loop exit
PB: predicated region body
PF: predicated region fallthrough
CT: control target
= control target key end

     0   :  { %7 = vsyncpa [#allocation3], 0  ;;  %s397_s0 = inlined_call_operand.hbm [shape: f32[2,4,8,128], index: 0, kind: input, shape index: {}]   ;;  %s398_s1 = inlined_call_operand.hbm [shape: bf16[2,4,8,128], index: 1, kind: input, shape index: {}]   ;;  %s399_s2 = inlined_call_operand.hbm [shape: f32[1,3,8,128], index: 2, kind: output, shape index: {}]  }
   0x1   :  { %8 = vsyncpa [#allocation6], 0 }
   0x2   :  { %9 = vsyncpa [#allocation4], 0  ;;  %s320_s9 = smov [#allocation2]  }
   0x3   :  { %s18_s10 = sshll.u32 %s320_s9, 4  ;;  %s19_s10 = int_to_ptr.vmem [resolvable:$true] %s18_s10 }
   0x4   :  { %s262_s11 = scalar_lea.vmem %s19_s10, 1024  ;;  %p267_p1 = scmp.lt.s32.totalorder %s19_s10, %s19_s10 }
   0x5   :  { %p263_p0 = scmp.ne.s32.totalorder %s19_s10, %s262_s11  ;;  %p268_p2 = scmp.lt.s32.totalorder %s262_s11, %s262_s11 }
   0x7   :  { %p269_p3 = por %p268_p2, %p267_p1 }
   0x9   :  { %p270_p4 = pnand %p269_p3, %p263_p0 }
   0xb   :  { %273 = shalt.err (!%p270_p4)
}
   0xc   :  { %s321_s12 = smov 128   ;;  %s322_s13 = smov 8  }
   0xd   :  { %24 = dma.hbm_to_vmem [thread:$0]  %s397_s0, 1024, %s19_s10, [#allocation3], %s321_s12, %s321_s12, %s322_s13  }
   0xe   :  { %s323_s16 = smov [#allocation5]  }
   0xf   :  { %s33_s17 = sshll.u32 %s323_s16, 4  ;;  %s34_s17 = int_to_ptr.vmem [resolvable:$true] %s33_s17 }
  0x10   :  { %s282_s18 = scalar_lea.vmem %s34_s17, 512  ;;  %p287_p6 = scmp.lt.s32.totalorder %s34_s17, %s34_s17 }
  0x11   :  { %p283_p5 = scmp.ne.s32.totalorder %s34_s17, %s282_s18  ;;  %p288_p7 = scmp.lt.s32.totalorder %s282_s18, %s282_s18 }
  0x13   :  { %p289_p8 = por %p288_p7, %p287_p6 }
  0x15   :  { %p290_p9 = pnand %p289_p8, %p283_p5 }
  0x17   :  { %293 = shalt.err (!%p290_p9)
}
  0x18   :  { %s324_s19 = smov 64   ;;  %s325_s20 = smov 4  }
  0x19   :  { %39 = dma.hbm_to_vmem [thread:$0]  %s398_s1, 512, %s34_s17, [#allocation6], %s324_s19, %s324_s19, %s325_s20  }
  0x1a   :  { %314 = dma.done.wait [#allocation3], 1024  }
  0x1b   :  { %315 = vsyncadd [#allocation3], 4294966272 }
  0x1c   :  { %316 = dma.done.wait [#allocation6], 512  }
  0x1d   :  { %317 = vsyncadd [#allocation6], 4294966784  ;;  %v57_v0 = vld [vmem:[#allocation2] sm:$0xff]  ;;  %v58_v1 = vld [vmem:[#allocation2 + $0x8] sm:$0xff]  ;;  %s326_s0 = smov [#allocation7]  }
  0x1e   :  { %v59_v2 = vld [vmem:[#allocation2 + $0x10] sm:$0xff]  ;;  %v61_v3 = vld [vmem:[#allocation2 + $0x20] sm:$0xff]  ;;  %v62_v4 = vld [vmem:[#allocation2 + $0x28] sm:$0xff]  ;;  %v73_v5 = vmax.f32 %v57_v0, %v58_v1  ;;  %s190_s1 = sshll.u32 %s326_s0, 4  ;;  %s191_s1 = int_to_ptr.vmem [resolvable:$true] %s190_s1 }
  0x1f   :  { %v60_v6 = vld [vmem:[#allocation2 + $0x18] sm:$0xff]  ;;  %v63_v7 = vld [vmem:[#allocation2 + $0x30] sm:$0xff]  ;;  %v204_v8 = vld [vmem:[#allocation5] sm:$0xff]   ;;  %v74_v9 = vmax.f32 %v61_v3, %v62_v4  ;;  %s294_s23 = scalar_lea.vmem %s191_s1, 384  ;;  %p299_p11 = scmp.lt.s32.totalorder %s191_s1, %s191_s1 }
  0x20   :  { %v351_v10 = vunpack.c.l.bf16 %v204_v8  ;;  %v353_v11 = vunpack.c.h.bf16 %v204_v8  ;;  %v219_v12 = vld [vmem:[#allocation5 + $0x8] sm:$0xff]   ;;  %v220_v13 = vld [vmem:[#allocation5 + $0x10] sm:$0xff]   ;;  %v221_v14 = vld [vmem:[#allocation5 + $0x18] sm:$0xff]   ;;  %v75_v15 = vmax.f32 %v73_v5, %v59_v2  ;;  %p295_p10 = scmp.ne.s32.totalorder %s191_s1, %s294_s23  ;;  %p300_p12 = scmp.lt.s32.totalorder %s294_s23, %s294_s23 }
  0x21   :  { %v64_v16 = vld [vmem:[#allocation2 + $0x38] sm:$0xff]  ;;  %v355_v17 = vunpack.c.l.bf16 %v220_v13  ;;  %v357_v18 = vunpack.c.h.bf16 %v220_v13  ;;  %v359_v19 = vunpack.c.l.bf16 %v219_v12  ;;  %v76_v20 = vmax.f32 %v74_v9, %v63_v7 }
  0x22   :  { %v77_v21 = vmax.f32 %v75_v15, %v60_v6  ;;  %v361_v22 = vunpack.c.l.bf16 %v221_v14  ;;  %v109_v23 = vadd.f32 %v353_v11, %v351_v10  ;;  %v367_v29 = vunpack.c.h.bf16 %v219_v12  ;;  %p301_p13 = por %p300_p12, %p299_p11 }
  0x23   :  { %v110_v24 = vadd.f32 %v357_v18, %v355_v17  ;;  %v78_v25 = vmax.f32 %v76_v20, %v64_v16  ;;  %v369_v30 = vunpack.c.h.bf16 %v221_v14 }
  0x24   :  { %v79_v26 = vsub.f32 %v57_v0, %v77_v21  ;;  %v99_v27 = vsub.f32 %v58_v1, %v77_v21  ;;  %v119_v28 = vsub.f32 %v59_v2, %v77_v21  ;;  %v129_v34 = vadd.f32 %v359_v19, %v109_v23  ;;  %p302_p0 = pnand %p301_p13, %p295_p10 }
  0x25   :  { %v80_v31 = vsub.f32 %v61_v3, %v78_v25  ;;  %v100_v33 = vsub.f32 %v62_v4, %v78_v25  ;;  %v120_v36 = vsub.f32 %v63_v7, %v78_v25  ;;  %v130_v37 = vadd.f32 %v361_v22, %v110_v24 }
  0x26   :  { %v81_v32 = vmul.f32 1.442695, %v79_v26  ;;  %v101_v35 = vmul.f32 1.442695, %v99_v27  ;;  %v139_v38 = vsub.f32 %v60_v6, %v77_v21  ;;  %v121_v41 = vmul.f32 1.442695, %v119_v28 }
  0x27   :  { %v83_v39 = vmul.f32 1.442695, %v80_v31  ;;  %v103_v40 = vmul.f32 1.442695, %v100_v33  ;;  %v123_v42 = vmul.f32 1.442695, %v120_v36  ;;  %v140_v43 = vsub.f32 %v64_v16, %v78_v25 }
  0x28   :  { %230 = vpow2.f32 %v81_v32  ;;  %v141_v44 = vmul.f32 1.442695, %v139_v38  ;;  %v149_v46 = vadd.f32 %v367_v29, %v129_v34  ;;  %v150_v47 = vadd.f32 %v369_v30, %v130_v37 }
  0x29   :  { %232 = vpow2.f32 %v101_v35  ;;  %v143_v45 = vmul.f32 1.442695, %v140_v43  ;;  %v91_v3 = vmul.f32 %v351_v10, %v79_v26  ;;  %v111_v4 = vmul.f32 %v353_v11, %v99_v27 }
  0x2a   :  { %234 = vpow2.f32 %v83_v39  ;;  %v182_v48 = vadd.f32 %v150_v47, %v149_v46  ;;  %v92_v5 = vmul.f32 %v355_v17, %v80_v31  ;;  %v112_v6 = vmul.f32 %v357_v18, %v100_v33 }
  0x2b   :  { %236 = vpow2.f32 %v103_v40  ;;  %v113_v13 = vadd.f32 %v111_v4, %v91_v3  ;;  %v131_v14 = vmul.f32 %v359_v19, %v119_v28  ;;  %v151_v21 = vmul.f32 %v367_v29, %v139_v38 }
  0x2c   :  { %238 = vpow2.f32 %v121_v41  ;;  %184 = vst [vmem:[#allocation7 + $0x10] sm:$0xff] %v182_v48  ;;  %v114_v15 = vadd.f32 %v112_v6, %v92_v5  ;;  %v152_v24 = vmul.f32 %v369_v30, %v140_v43 }
  0x2d   :  { %240 = vpow2.f32 %v123_v42 }
  0x2e   :  { %242 = vpow2.f32 %v141_v44 }
  0x2f   :  { %244 = vpow2.f32 %v143_v45 }
  0x35   :  { %v231_v49 = vpop.eup %230 }
  0x36   :  { %v233_v50 = vpop.eup %232  ;;  %v95_v63 = vmul.f32 %v231_v49, %v351_v10  ;;  %v132_v10 = vmul.f32 %v361_v22, %v120_v36 }
  0x37   :  { %v235_v51 = vpop.eup %234  ;;  %v107_v52 = vadd.f32 %v233_v50, %v231_v49  ;;  %v115_v0 = vmul.f32 %v233_v50, %v353_v11 }
  0x38   :  { %v237_v53 = vpop.eup %236  ;;  %v96_v1 = vmul.f32 %v235_v51, %v355_v17  ;;  %v134_v23 = vadd.f32 %v132_v10, %v114_v15 }
  0x39   :  { %v239_v54 = vpop.eup %238  ;;  %v108_v55 = vadd.f32 %v237_v53, %v235_v51  ;;  %v116_v2 = vmul.f32 %v237_v53, %v357_v18  ;;  %v117_v7 = vadd.f32 %v115_v0, %v95_v63  ;;  %v133_v18 = vadd.f32 %v131_v14, %v113_v13 }
  0x3a   :  { %v241_v56 = vpop.eup %240  ;;  %v127_v57 = vadd.f32 %v239_v54, %v107_v52  ;;  %v135_v8 = vmul.f32 %v239_v54, %v359_v19 }
  0x3b   :  { %v243_v58 = vpop.eup %242  ;;  %v128_v59 = vadd.f32 %v241_v56, %v108_v55  ;;  %v118_v9 = vadd.f32 %v116_v2, %v96_v1  ;;  %v136_v12 = vmul.f32 %v241_v56, %v361_v22  ;;  %v153_v19 = vadd.f32 %v151_v21, %v133_v18 }
  0x3c   :  { %v245_v60 = vpop.eup %244  ;;  %v147_v61 = vadd.f32 %v243_v58, %v127_v57  ;;  %v137_v16 = vadd.f32 %v135_v8, %v117_v7  ;;  %v155_v11 = vmul.f32 %v243_v58, %v367_v29  ;;  %v154_v22 = vadd.f32 %v152_v24, %v134_v23 }
  0x3d   :  { %v148_v62 = vadd.f32 %v245_v60, %v128_v59  ;;  %v138_v20 = vadd.f32 %v136_v12, %v118_v9  ;;  %v156_v17 = vmul.f32 %v245_v60, %v369_v30 }
  0x3e   :  { %246 = vlog2.f32 %v147_v61  ;;  %v157_v25 = vadd.f32 %v155_v11, %v137_v16 }
  0x3f   :  { %248 = vlog2.f32 %v148_v62  ;;  %v158_v27 = vadd.f32 %v156_v17, %v138_v20 }
  0x40   :  { %250 = vrcp.f32 %v147_v61 }
  0x41   :  { %252 = vrcp.f32 %v148_v62 }
  0x4b   :  { %v247_v26 = vpop.eup %246 }
  0x4c   :  { %v249_v31 = vpop.eup %248  ;;  %v160_v28 = vmul.f32 0.6931472, %v247_v26 }
  0x4d   :  { %v251_v32 = vpop.eup %250  ;;  %v162_v33 = vmul.f32 0.6931472, %v249_v31 }
  0x4e   :  { %v253_v34 = vpop.eup %252  ;;  %v163_v35 = vmul.f32 %v160_v28, %v149_v46  ;;  %v168_v36 = vmul.f32 %v251_v32, %v157_v25 }
  0x4f   :  { %v164_v37 = vmul.f32 %v162_v33, %v150_v47  ;;  %v170_v39 = vmul.f32 %v253_v34, %v158_v27 }
  0x50   :  { %v165_v40 = vsub.f32 %v163_v35, %v153_v19 }
  0x51   :  { %v166_v41 = vsub.f32 %v164_v37, %v154_v22  ;;  %v177_v29 = vadd.f32 %v170_v39, %v168_v36 }
  0x53   :  { %v172_v30 = vadd.f32 %v166_v41, %v165_v40  ;;  %179 = vst [vmem:[#allocation7 + $0x8] sm:$0xff] %v177_v29 }
  0x55   :  { %174 = vst [vmem:[#allocation7] sm:$0xff] %v172_v30 }
  0x56   :  { %305 = shalt.err (!%p302_p0)
}
  0x57   :  { %196 = dma.vmem_to_hbm [thread:$0]  %s191_s1, 384, %s399_s2, [#allocation4], %s321_s12, %s321_s12, %s322_s13  }
  0x58   :  { %318 = dma.done.wait [#allocation4], 384  }
  0x59   :  { %319 = vsyncadd [#allocation4], 4294966912 }
  0x5a   :  { %200 = vsyncpa [#allocation3], 1 }
  0x5b   :  { %201 = vsyncpa [#allocation6], 1 }
  0x5c   :  { %202 = vsyncpa [#allocation4], 1 }

</bundles_post_ra>
